<compile_context>
chip_gen: v6e
topology: v6e:2x2x1
jax: 0.10.0
libtpu: 0.0.40
codegen_flags: <defaults>
</compile_context>

<pallas_src>
import functools

import jax
import jax.numpy as jnp
from jax.experimental import pallas as pl
from jax.experimental.pallas import tpu as pltpu


# ----------------------------- glue (plain JAX) -----------------------------

def positioning_encoding(seq_length, model_dim):
    """Same formula as the PyTorch reference (returns (1, S, D))."""
    position = jnp.arange(seq_length, dtype=jnp.float32).reshape(1, -1, 1)
    dimension = jnp.arange(model_dim, dtype=jnp.float32).reshape(1, 1, -1)
    phase = (position / 10000.0) ** jnp.floor(dimension / model_dim)
    return jnp.where(dimension.astype(jnp.int32) % 2 == 0,
                     -jnp.sin(phase), jnp.cos(phase))


def init_params(key, model_dim, num_heads, forward_dim):
    kd = vd = model_dim // num_heads
    keys = jax.random.split(key, 12)
    u = lambda k, shape, s=0.1: (jax.random.normal(k, shape, jnp.float32) * s)
    params = dict(
        wq=u(keys[0], (model_dim, kd)), bq=u(keys[1], (1, kd)),
        wk=u(keys[2], (model_dim, kd)), bk=u(keys[3], (1, kd)),
        wv=u(keys[4], (model_dim, vd)), bv=u(keys[5], (1, vd)),
        wo=u(keys[6], (num_heads * vd, model_dim)), bo=u(keys[7], (1, model_dim)),
        g1=jnp.ones((1, model_dim), jnp.float32), bt1=jnp.zeros((1, model_dim), jnp.float32),
        w1=u(keys[8], (model_dim, forward_dim)), b1=u(keys[9], (1, forward_dim)),
        w2=u(keys[10], (forward_dim, model_dim)), b2=u(keys[11], (1, model_dim)),
        g2=jnp.ones((1, model_dim), jnp.float32), bt2=jnp.zeros((1, model_dim), jnp.float32),
    )
    return params


# ------------------------------- Pallas kernel ------------------------------

def _layernorm(x, gamma, beta, eps=1e-5):
    mean = jnp.mean(x, axis=-1, keepdims=True)
    var = jnp.mean((x - mean) ** 2, axis=-1, keepdims=True)
    return (x - mean) * jax.lax.rsqrt(var + eps) * gamma + beta


def encoder_kernel(x_ref, pe_ref, wqkv_ref, wo_ref, w1_ref, w2_ref, bias_ref,
                   out_ref, *, n_layers, kd, vd):
    # One batch element per grid step: x_ref block is (1, S, D).
    h = x_ref[0] + pe_ref[...]                       # (S, D)

    wqkv = wqkv_ref[...]                             # (D, 2*kd + vd)
    wo = wo_ref[...]                                 # (vd, D)   -- head-concat folded
    w1 = w1_ref[...]                                 # (D, FF)
    w2 = w2_ref[...]                                 # (FF, D)

    D = h.shape[-1]
    FF = w1.shape[-1]
    qkv_w = 2 * kd + vd

    bias = bias_ref[...]                             # packed (8, max_dim)
    bqkv = bias[0:1, :qkv_w]
    bo = bias[1:2, :D]
    g1 = bias[2:3, :D]
    bt1 = bias[3:4, :D]
    b1 = bias[4:5, :FF]
    b2 = bias[5:6, :D]
    g2 = bias[6:7, :D]
    bt2 = bias[7:8, :D]

    inv_scale = 1.0 / (float(kd) ** 0.5)

    for _ in range(n_layers):                        # same weights every layer
        # --- multi-head attention (all heads identical in the reference) ---
        qkv = jnp.dot(h, wqkv, preferred_element_type=jnp.float32) + bqkv  # (S, 3kd)
        q = qkv[:, :kd]
        k = qkv[:, kd:2 * kd]
        v = qkv[:, 2 * kd:qkv_w]

        scores = jax.lax.dot_general(
            q, k, (((1,), (1,)), ((), ())),
            preferred_element_type=jnp.float32) * inv_scale                # (S, S)
        m = jnp.max(scores, axis=-1, keepdims=True)
        e = jnp.exp(scores - m)
        inv_l = pl.reciprocal(jnp.sum(e, axis=-1, keepdims=True), approx=False)
        # Normalize after the (S,S)@(S,vd) matmul: cheaper than scaling p itself.
        attn = jnp.dot(e, v, preferred_element_type=jnp.float32) * inv_l   # (S, vd)

        # Head-concat folded into wo_eff (wrapper): attn @ wo_eff + bo.
        mha = jnp.dot(attn, wo, preferred_element_type=jnp.float32) + bo   # (S, D)

        att_out = _layernorm(h + mha, g1, bt1)                             # residual + LN

        # --- feed-forward ---
        ff = jnp.maximum(
            jnp.dot(att_out, w1, preferred_element_type=jnp.float32) + b1, 0.0)
        ff = jnp.dot(ff, w2, preferred_element_type=jnp.float32) + b2

        h = _layernorm(att_out + ff, g2, bt2)                              # residual + LN

    out_ref[0] = h


def encoder_forward(x, params, *, n_layers, num_heads):
    B, S, D = x.shape
    kd = params["wq"].shape[-1]
    vd = params["wv"].shape[-1]
    FF = params["w1"].shape[-1]

    pe = positioning_encoding(S, D)[0]               # (S, D)

    # Fuse Q/K/V projections into a single matmul weight.
    wqkv = jnp.concatenate([params["wq"], params["wk"], params["wv"]], axis=-1)
    # Fold the identical-head concat into the output projection:
    # cat([attn]*H) @ Wo == attn @ Wo.reshape(H, vd, D).sum(0).
    wo_eff = params["wo"].reshape(num_heads, vd, D).sum(axis=0)

    # Pack all small bias / gain vectors into one (8, max_dim) slab.
    max_dim = max(2 * kd + vd, D, FF)

    def pad_row(v):
        v = v.reshape(1, -1)
        return jnp.pad(v, ((0, 0), (0, max_dim - v.shape[-1])))

    bqkv = jnp.concatenate([params["bq"], params["bk"], params["bv"]], axis=-1)
    bias_pack = jnp.concatenate([
        pad_row(bqkv), pad_row(params["bo"]),
        pad_row(params["g1"]), pad_row(params["bt1"]),
        pad_row(params["b1"]), pad_row(params["b2"]),
        pad_row(params["g2"]), pad_row(params["bt2"]),
    ], axis=0)                                        # (8, max_dim)

    kernel = functools.partial(encoder_kernel, n_layers=n_layers, kd=kd, vd=vd)

    def full_spec(shape):
        return pl.BlockSpec(shape, lambda b: (0,) * len(shape))

    in_specs = [pl.BlockSpec((1, S, D), lambda b: (b, 0, 0)),
                full_spec(pe.shape),
                full_spec(wqkv.shape),
                full_spec(wo_eff.shape),
                full_spec(params["w1"].shape),
                full_spec(params["w2"].shape),
                full_spec(bias_pack.shape)]

    return pl.pallas_call(
        kernel,
        out_shape=jax.ShapeDtypeStruct((B, S, D), jnp.float32),
        grid_spec=pltpu.PrefetchScalarGridSpec(
            num_scalar_prefetch=0,
            grid=(B,),
            in_specs=in_specs,
            out_specs=pl.BlockSpec((1, S, D), lambda b: (b, 0, 0)),
        ),
        compiler_params=pltpu.CompilerParams(
            dimension_semantics=("parallel",)),       # v7x: one batch elem per TC
    )(x, pe, wqkv, wo_eff, params["w1"], params["w2"], bias_pack)


# --------------------------- pure-JAX reference ------------------------------

def encoder_reference(x, params, *, n_layers, num_heads):
    pe = positioning_encoding(x.shape[1], x.shape[2])
    h = x + pe
    p = params
    scale = float(p["wq"].shape[-1]) ** 0.5
    for _ in range(n_layers):
        q = h @ p["wq"] + p["bq"]
        k = h @ p["wk"] + p["bk"]
        v = h @ p["wv"] + p["bv"]
        scores = jnp.einsum("bqd,bkd->bqk", q, k) / scale
        attn = jax.nn.softmax(scores, axis=-1) @ v
        cat = jnp.concatenate([attn] * num_heads, axis=-1)
        mha = cat @ p["wo"] + p["bo"]
        att_out = _layernorm(h + mha, p["g1"], p["bt1"])
        ff = jax.nn.relu(att_out @ p["w1"] + p["b1"]) @ p["w2"] + p["b2"]
        h = _layernorm(att_out + ff, p["g2"], p["bt2"])
    return h


# ----------------------------------- main ------------------------------------

if __name__ == "__main__":
    B, S, D = 2, 8, 32          # batch, seq, model_dim
    NUM_HEADS = 8               # key_dim = value_dim = D // NUM_HEADS = 4
    FORWARD_DIM = 64
    N_LAYERS = 2

    key = jax.random.PRNGKey(0)
    kx, kp = jax.random.split(key)
    x = jax.random.uniform(kx, (B, S, D), jnp.float32)
    params = init_params(kp, D, NUM_HEADS, FORWARD_DIM)

    out = encoder_forward(x, params, n_layers=N_LAYERS, num_heads=NUM_HEADS)
    out = jax.block_until_ready(out)

    ref = encoder_reference(x, params, n_layers=N_LAYERS, num_heads=NUM_HEADS)
    assert out.shape == (B, S, D)
    assert jnp.allclose(out, ref, atol=1e-4, rtol=1e-4), \
        f"max err {jnp.max(jnp.abs(out - ref))}"

    print("KERNEL_OK")
</pallas_src>

<mosaic_0001>
module attributes {stable_mosaic.version = 11 : i64} {
  func.func @encoder_kernel(%arg0: i32, %arg1: memref<1x8x32xf32, #tpu.memory_space<vmem>>, %arg2: memref<8x32xf32, #tpu.memory_space<vmem>>, %arg3: memref<32x12xf32, #tpu.memory_space<vmem>>, %arg4: memref<4x32xf32, #tpu.memory_space<vmem>>, %arg5: memref<32x64xf32, #tpu.memory_space<vmem>>, %arg6: memref<64x32xf32, #tpu.memory_space<vmem>>, %arg7: memref<8x64xf32, #tpu.memory_space<vmem>>, %arg8: memref<1x8x32xf32, #tpu.memory_space<vmem>>) attributes {dimension_semantics = [#tpu.dimension_semantics<parallel>], iteration_bounds = array<i64: 2>, scalar_prefetch = 0 : i64, scratch_operands = 0 : i64, tpu.core_type = #tpu.core_type<tc>, window_params = [{transform_indices = @transform_0, window_bounds = array<i64: 1, 8, 32>}, {pipeline_mode = #tpu.pipeline_mode<synchronous>, transform_indices = @transform_1, window_bounds = array<i64: 8, 32>}, {pipeline_mode = #tpu.pipeline_mode<synchronous>, transform_indices = @transform_2, window_bounds = array<i64: 32, 12>}, {pipeline_mode = #tpu.pipeline_mode<synchronous>, transform_indices = @transform_3, window_bounds = array<i64: 4, 32>}, {pipeline_mode = #tpu.pipeline_mode<synchronous>, transform_indices = @transform_4, window_bounds = array<i64: 32, 64>}, {pipeline_mode = #tpu.pipeline_mode<synchronous>, transform_indices = @transform_5, window_bounds = array<i64: 64, 32>}, {pipeline_mode = #tpu.pipeline_mode<synchronous>, transform_indices = @transform_6, window_bounds = array<i64: 8, 64>}, {transform_indices = @transform_7, window_bounds = array<i64: 1, 8, 32>}]} {
    %c0 = arith.constant 0 : index
    %c0_0 = arith.constant 0 : index
    %c0_1 = arith.constant 0 : index
    %0 = vector.load %arg1[%c0, %c0_0, %c0_1] : memref<1x8x32xf32, #tpu.memory_space<vmem>>, vector<1x8x32xf32>
    %1 = vector.shape_cast %0 : vector<1x8x32xf32> to vector<8x32xf32>
    %c0_2 = arith.constant 0 : index
    %c0_3 = arith.constant 0 : index
    %2 = vector.load %arg2[%c0_2, %c0_3] : memref<8x32xf32, #tpu.memory_space<vmem>>, vector<8x32xf32>
    %3 = arith.addf %1, %2 : vector<8x32xf32>
    %c0_4 = arith.constant 0 : index
    %c0_5 = arith.constant 0 : index
    %4 = vector.load %arg3[%c0_4, %c0_5] : memref<32x12xf32, #tpu.memory_space<vmem>>, vector<32x12xf32>
    %c0_6 = arith.constant 0 : index
    %c0_7 = arith.constant 0 : index
    %5 = vector.load %arg4[%c0_6, %c0_7] : memref<4x32xf32, #tpu.memory_space<vmem>>, vector<4x32xf32>
    %c0_8 = arith.constant 0 : index
    %c0_9 = arith.constant 0 : index
    %6 = vector.load %arg5[%c0_8, %c0_9] : memref<32x64xf32, #tpu.memory_space<vmem>>, vector<32x64xf32>
    %c0_10 = arith.constant 0 : index
    %c0_11 = arith.constant 0 : index
    %7 = vector.load %arg6[%c0_10, %c0_11] : memref<64x32xf32, #tpu.memory_space<vmem>>, vector<64x32xf32>
    %c0_12 = arith.constant 0 : index
    %c0_13 = arith.constant 0 : index
    %8 = vector.load %arg7[%c0_12, %c0_13] : memref<8x64xf32, #tpu.memory_space<vmem>>, vector<8x64xf32>
    %9 = vector.extract_strided_slice %8 {offsets = [0, 0], sizes = [1, 12], strides = [1, 1]} : vector<8x64xf32> to vector<1x12xf32>
    %10 = vector.extract_strided_slice %8 {offsets = [1, 0], sizes = [1, 32], strides = [1, 1]} : vector<8x64xf32> to vector<1x32xf32>
    %11 = vector.extract_strided_slice %8 {offsets = [2, 0], sizes = [1, 32], strides = [1, 1]} : vector<8x64xf32> to vector<1x32xf32>
    %12 = vector.extract_strided_slice %8 {offsets = [3, 0], sizes = [1, 32], strides = [1, 1]} : vector<8x64xf32> to vector<1x32xf32>
    %13 = vector.extract_strided_slice %8 {offsets = [4, 0], sizes = [1, 64], strides = [1, 1]} : vector<8x64xf32> to vector<1x64xf32>
    %14 = vector.extract_strided_slice %8 {offsets = [5, 0], sizes = [1, 32], strides = [1, 1]} : vector<8x64xf32> to vector<1x32xf32>
    %15 = vector.extract_strided_slice %8 {offsets = [6, 0], sizes = [1, 32], strides = [1, 1]} : vector<8x64xf32> to vector<1x32xf32>
    %16 = vector.extract_strided_slice %8 {offsets = [7, 0], sizes = [1, 32], strides = [1, 1]} : vector<8x64xf32> to vector<1x32xf32>
    %cst = arith.constant dense<0.000000e+00> : vector<8x12xf32>
    %17 = tpu.matmul %3, %4, %cst {dimension_numbers = #tpu.dot_dimension_numbers<[1], [0], [0], [1], [0, 0, 1, 1], [], []>} : vector<8x32xf32>, vector<32x12xf32>, vector<8x12xf32> -> vector<8x12xf32>
    %18 = vector.broadcast %9 : vector<1x12xf32> to vector<8x12xf32>
    %19 = arith.addf %17, %18 : vector<8x12xf32>
    %20 = vector.extract_strided_slice %19 {offsets = [0, 0], sizes = [8, 4], strides = [1, 1]} : vector<8x12xf32> to vector<8x4xf32>
    %21 = vector.extract_strided_slice %19 {offsets = [0, 4], sizes = [8, 4], strides = [1, 1]} : vector<8x12xf32> to vector<8x4xf32>
    %22 = vector.extract_strided_slice %19 {offsets = [0, 8], sizes = [8, 4], strides = [1, 1]} : vector<8x12xf32> to vector<8x4xf32>
    %cst_14 = arith.constant dense<0.000000e+00> : vector<8x8xf32>
    %23 = tpu.matmul %20, %21, %cst_14 {dimension_numbers = #tpu.dot_dimension_numbers<[1], [1], [0], [0], [0, 0, 1, 0], [], []>} : vector<8x4xf32>, vector<8x4xf32>, vector<8x8xf32> -> vector<8x8xf32>
    %cst_15 = arith.constant 5.000000e-01 : f32
    %24 = vector.broadcast %cst_15 : f32 to vector<8x8xf32>
    %25 = arith.mulf %23, %24 : vector<8x8xf32>
    %cst_16 = arith.constant dense<0xFF800000> : vector<8xf32>
    %26 = vector.multi_reduction <maximumf>, %25, %cst_16 [1] : vector<8x8xf32> to vector<8xf32>
    %27 = vector.shape_cast %26 : vector<8xf32> to vector<8x1xf32>
    %28 = vector.broadcast %27 : vector<8x1xf32> to vector<8x8xf32>
    %29 = arith.subf %25, %28 : vector<8x8xf32>
    %30 = math.exp %29 : vector<8x8xf32>
    %cst_17 = arith.constant dense<0.000000e+00> : vector<8xf32>
    %31 = vector.multi_reduction <add>, %30, %cst_17 [1] : vector<8x8xf32> to vector<8xf32>
    %32 = vector.shape_cast %31 : vector<8xf32> to vector<8x1xf32>
    %33 = tpu.reciprocal %32 : vector<8x1xf32> -> vector<8x1xf32>
    %cst_18 = arith.constant dense<0.000000e+00> : vector<8x4xf32>
    %34 = tpu.matmul %30, %22, %cst_18 {dimension_numbers = #tpu.dot_dimension_numbers<[1], [0], [0], [1], [0, 0, 1, 1], [], []>} : vector<8x8xf32>, vector<8x4xf32>, vector<8x4xf32> -> vector<8x4xf32>
    %35 = vector.broadcast %33 : vector<8x1xf32> to vector<8x4xf32>
    %36 = arith.mulf %34, %35 : vector<8x4xf32>
    %cst_19 = arith.constant dense<0.000000e+00> : vector<8x32xf32>
    %37 = tpu.matmul %36, %5, %cst_19 {dimension_numbers = #tpu.dot_dimension_numbers<[1], [0], [0], [1], [0, 0, 1, 1], [], []>} : vector<8x4xf32>, vector<4x32xf32>, vector<8x32xf32> -> vector<8x32xf32>
    %38 = vector.broadcast %10 : vector<1x32xf32> to vector<8x32xf32>
    %39 = arith.addf %37, %38 : vector<8x32xf32>
    %40 = arith.addf %3, %39 : vector<8x32xf32>
    %cst_20 = arith.constant dense<0.000000e+00> : vector<8xf32>
    %41 = vector.multi_reduction <add>, %40, %cst_20 [1] : vector<8x32xf32> to vector<8xf32>
    %42 = vector.shape_cast %41 : vector<8xf32> to vector<8x1xf32>
    %cst_21 = arith.constant 3.200000e+01 : f32
    %43 = vector.broadcast %cst_21 : f32 to vector<8x1xf32>
    %44 = arith.divf %42, %43 : vector<8x1xf32>
    %45 = vector.broadcast %44 : vector<8x1xf32> to vector<8x32xf32>
    %46 = arith.subf %40, %45 : vector<8x32xf32>
    %47 = arith.mulf %46, %46 : vector<8x32xf32>
    %cst_22 = arith.constant dense<0.000000e+00> : vector<8xf32>
    %48 = vector.multi_reduction <add>, %47, %cst_22 [1] : vector<8x32xf32> to vector<8xf32>
    %49 = vector.shape_cast %48 : vector<8xf32> to vector<8x1xf32>
    %cst_23 = arith.constant 3.200000e+01 : f32
    %50 = vector.broadcast %cst_23 : f32 to vector<8x1xf32>
    %51 = arith.divf %49, %50 : vector<8x1xf32>
    %52 = vector.broadcast %44 : vector<8x1xf32> to vector<8x32xf32>
    %53 = arith.subf %40, %52 : vector<8x32xf32>
    %cst_24 = arith.constant 9.99999974E-6 : f32
    %54 = vector.broadcast %cst_24 : f32 to vector<8x1xf32>
    %55 = arith.addf %51, %54 : vector<8x1xf32>
    %56 = math.rsqrt %55 : vector<8x1xf32>
    %57 = vector.broadcast %56 : vector<8x1xf32> to vector<8x32xf32>
    %58 = arith.mulf %53, %57 : vector<8x32xf32>
    %59 = vector.broadcast %11 : vector<1x32xf32> to vector<8x32xf32>
    %60 = arith.mulf %58, %59 : vector<8x32xf32>
    %61 = vector.broadcast %12 : vector<1x32xf32> to vector<8x32xf32>
    %62 = arith.addf %60, %61 : vector<8x32xf32>
    %cst_25 = arith.constant dense<0.000000e+00> : vector<8x64xf32>
    %63 = tpu.matmul %62, %6, %cst_25 {dimension_numbers = #tpu.dot_dimension_numbers<[1], [0], [0], [1], [0, 0, 1, 1], [], []>} : vector<8x32xf32>, vector<32x64xf32>, vector<8x64xf32> -> vector<8x64xf32>
    %64 = vector.broadcast %13 : vector<1x64xf32> to vector<8x64xf32>
    %65 = arith.addf %63, %64 : vector<8x64xf32>
    %cst_26 = arith.constant 0.000000e+00 : f32
    %66 = vector.broadcast %cst_26 : f32 to vector<8x64xf32>
    %67 = arith.maximumf %65, %66 : vector<8x64xf32>
    %cst_27 = arith.constant dense<0.000000e+00> : vector<8x32xf32>
    %68 = tpu.matmul %67, %7, %cst_27 {dimension_numbers = #tpu.dot_dimension_numbers<[1], [0], [0], [1], [0, 0, 1, 1], [], []>} : vector<8x64xf32>, vector<64x32xf32>, vector<8x32xf32> -> vector<8x32xf32>
    %69 = vector.broadcast %14 : vector<1x32xf32> to vector<8x32xf32>
    %70 = arith.addf %68, %69 : vector<8x32xf32>
    %71 = arith.addf %62, %70 : vector<8x32xf32>
    %cst_28 = arith.constant dense<0.000000e+00> : vector<8xf32>
    %72 = vector.multi_reduction <add>, %71, %cst_28 [1] : vector<8x32xf32> to vector<8xf32>
    %73 = vector.shape_cast %72 : vector<8xf32> to vector<8x1xf32>
    %cst_29 = arith.constant 3.200000e+01 : f32
    %74 = vector.broadcast %cst_29 : f32 to vector<8x1xf32>
    %75 = arith.divf %73, %74 : vector<8x1xf32>
    %76 = vector.broadcast %75 : vector<8x1xf32> to vector<8x32xf32>
    %77 = arith.subf %71, %76 : vector<8x32xf32>
    %78 = arith.mulf %77, %77 : vector<8x32xf32>
    %cst_30 = arith.constant dense<0.000000e+00> : vector<8xf32>
    %79 = vector.multi_reduction <add>, %78, %cst_30 [1] : vector<8x32xf32> to vector<8xf32>
    %80 = vector.shape_cast %79 : vector<8xf32> to vector<8x1xf32>
    %cst_31 = arith.constant 3.200000e+01 : f32
    %81 = vector.broadcast %cst_31 : f32 to vector<8x1xf32>
    %82 = arith.divf %80, %81 : vector<8x1xf32>
    %83 = vector.broadcast %75 : vector<8x1xf32> to vector<8x32xf32>
    %84 = arith.subf %71, %83 : vector<8x32xf32>
    %cst_32 = arith.constant 9.99999974E-6 : f32
    %85 = vector.broadcast %cst_32 : f32 to vector<8x1xf32>
    %86 = arith.addf %82, %85 : vector<8x1xf32>
    %87 = math.rsqrt %86 : vector<8x1xf32>
    %88 = vector.broadcast %87 : vector<8x1xf32> to vector<8x32xf32>
    %89 = arith.mulf %84, %88 : vector<8x32xf32>
    %90 = vector.broadcast %15 : vector<1x32xf32> to vector<8x32xf32>
    %91 = arith.mulf %89, %90 : vector<8x32xf32>
    %92 = vector.broadcast %16 : vector<1x32xf32> to vector<8x32xf32>
    %93 = arith.addf %91, %92 : vector<8x32xf32>
    %cst_33 = arith.constant dense<0.000000e+00> : vector<8x12xf32>
    %94 = tpu.matmul %93, %4, %cst_33 {dimension_numbers = #tpu.dot_dimension_numbers<[1], [0], [0], [1], [0, 0, 1, 1], [], []>} : vector<8x32xf32>, vector<32x12xf32>, vector<8x12xf32> -> vector<8x12xf32>
    %95 = vector.broadcast %9 : vector<1x12xf32> to vector<8x12xf32>
    %96 = arith.addf %94, %95 : vector<8x12xf32>
    %97 = vector.extract_strided_slice %96 {offsets = [0, 0], sizes = [8, 4], strides = [1, 1]} : vector<8x12xf32> to vector<8x4xf32>
    %98 = vector.extract_strided_slice %96 {offsets = [0, 4], sizes = [8, 4], strides = [1, 1]} : vector<8x12xf32> to vector<8x4xf32>
    %99 = vector.extract_strided_slice %96 {offsets = [0, 8], sizes = [8, 4], strides = [1, 1]} : vector<8x12xf32> to vector<8x4xf32>
    %cst_34 = arith.constant dense<0.000000e+00> : vector<8x8xf32>
    %100 = tpu.matmul %97, %98, %cst_34 {dimension_numbers = #tpu.dot_dimension_numbers<[1], [1], [0], [0], [0, 0, 1, 0], [], []>} : vector<8x4xf32>, vector<8x4xf32>, vector<8x8xf32> -> vector<8x8xf32>
    %cst_35 = arith.constant 5.000000e-01 : f32
    %101 = vector.broadcast %cst_35 : f32 to vector<8x8xf32>
    %102 = arith.mulf %100, %101 : vector<8x8xf32>
    %cst_36 = arith.constant dense<0xFF800000> : vector<8xf32>
    %103 = vector.multi_reduction <maximumf>, %102, %cst_36 [1] : vector<8x8xf32> to vector<8xf32>
    %104 = vector.shape_cast %103 : vector<8xf32> to vector<8x1xf32>
    %105 = vector.broadcast %104 : vector<8x1xf32> to vector<8x8xf32>
    %106 = arith.subf %102, %105 : vector<8x8xf32>
    %107 = math.exp %106 : vector<8x8xf32>
    %cst_37 = arith.constant dense<0.000000e+00> : vector<8xf32>
    %108 = vector.multi_reduction <add>, %107, %cst_37 [1] : vector<8x8xf32> to vector<8xf32>
    %109 = vector.shape_cast %108 : vector<8xf32> to vector<8x1xf32>
    %110 = tpu.reciprocal %109 : vector<8x1xf32> -> vector<8x1xf32>
    %cst_38 = arith.constant dense<0.000000e+00> : vector<8x4xf32>
    %111 = tpu.matmul %107, %99, %cst_38 {dimension_numbers = #tpu.dot_dimension_numbers<[1], [0], [0], [1], [0, 0, 1, 1], [], []>} : vector<8x8xf32>, vector<8x4xf32>, vector<8x4xf32> -> vector<8x4xf32>
    %112 = vector.broadcast %110 : vector<8x1xf32> to vector<8x4xf32>
    %113 = arith.mulf %111, %112 : vector<8x4xf32>
    %cst_39 = arith.constant dense<0.000000e+00> : vector<8x32xf32>
    %114 = tpu.matmul %113, %5, %cst_39 {dimension_numbers = #tpu.dot_dimension_numbers<[1], [0], [0], [1], [0, 0, 1, 1], [], []>} : vector<8x4xf32>, vector<4x32xf32>, vector<8x32xf32> -> vector<8x32xf32>
    %115 = vector.broadcast %10 : vector<1x32xf32> to vector<8x32xf32>
    %116 = arith.addf %114, %115 : vector<8x32xf32>
    %117 = arith.addf %93, %116 : vector<8x32xf32>
    %cst_40 = arith.constant dense<0.000000e+00> : vector<8xf32>
    %118 = vector.multi_reduction <add>, %117, %cst_40 [1] : vector<8x32xf32> to vector<8xf32>
    %119 = vector.shape_cast %118 : vector<8xf32> to vector<8x1xf32>
    %cst_41 = arith.constant 3.200000e+01 : f32
    %120 = vector.broadcast %cst_41 : f32 to vector<8x1xf32>
    %121 = arith.divf %119, %120 : vector<8x1xf32>
    %122 = vector.broadcast %121 : vector<8x1xf32> to vector<8x32xf32>
    %123 = arith.subf %117, %122 : vector<8x32xf32>
    %124 = arith.mulf %123, %123 : vector<8x32xf32>
    %cst_42 = arith.constant dense<0.000000e+00> : vector<8xf32>
    %125 = vector.multi_reduction <add>, %124, %cst_42 [1] : vector<8x32xf32> to vector<8xf32>
    %126 = vector.shape_cast %125 : vector<8xf32> to vector<8x1xf32>
    %cst_43 = arith.constant 3.200000e+01 : f32
    %127 = vector.broadcast %cst_43 : f32 to vector<8x1xf32>
    %128 = arith.divf %126, %127 : vector<8x1xf32>
    %129 = vector.broadcast %121 : vector<8x1xf32> to vector<8x32xf32>
    %130 = arith.subf %117, %129 : vector<8x32xf32>
    %cst_44 = arith.constant 9.99999974E-6 : f32
    %131 = vector.broadcast %cst_44 : f32 to vector<8x1xf32>
    %132 = arith.addf %128, %131 : vector<8x1xf32>
    %133 = math.rsqrt %132 : vector<8x1xf32>
    %134 = vector.broadcast %133 : vector<8x1xf32> to vector<8x32xf32>
    %135 = arith.mulf %130, %134 : vector<8x32xf32>
    %136 = vector.broadcast %11 : vector<1x32xf32> to vector<8x32xf32>
    %137 = arith.mulf %135, %136 : vector<8x32xf32>
    %138 = vector.broadcast %12 : vector<1x32xf32> to vector<8x32xf32>
    %139 = arith.addf %137, %138 : vector<8x32xf32>
    %cst_45 = arith.constant dense<0.000000e+00> : vector<8x64xf32>
    %140 = tpu.matmul %139, %6, %cst_45 {dimension_numbers = #tpu.dot_dimension_numbers<[1], [0], [0], [1], [0, 0, 1, 1], [], []>} : vector<8x32xf32>, vector<32x64xf32>, vector<8x64xf32> -> vector<8x64xf32>
    %141 = vector.broadcast %13 : vector<1x64xf32> to vector<8x64xf32>
    %142 = arith.addf %140, %141 : vector<8x64xf32>
    %cst_46 = arith.constant 0.000000e+00 : f32
    %143 = vector.broadcast %cst_46 : f32 to vector<8x64xf32>
    %144 = arith.maximumf %142, %143 : vector<8x64xf32>
    %cst_47 = arith.constant dense<0.000000e+00> : vector<8x32xf32>
    %145 = tpu.matmul %144, %7, %cst_47 {dimension_numbers = #tpu.dot_dimension_numbers<[1], [0], [0], [1], [0, 0, 1, 1], [], []>} : vector<8x64xf32>, vector<64x32xf32>, vector<8x32xf32> -> vector<8x32xf32>
    %146 = vector.broadcast %14 : vector<1x32xf32> to vector<8x32xf32>
    %147 = arith.addf %145, %146 : vector<8x32xf32>
    %148 = arith.addf %139, %147 : vector<8x32xf32>
    %cst_48 = arith.constant dense<0.000000e+00> : vector<8xf32>
    %149 = vector.multi_reduction <add>, %148, %cst_48 [1] : vector<8x32xf32> to vector<8xf32>
    %150 = vector.shape_cast %149 : vector<8xf32> to vector<8x1xf32>
    %cst_49 = arith.constant 3.200000e+01 : f32
    %151 = vector.broadcast %cst_49 : f32 to vector<8x1xf32>
    %152 = arith.divf %150, %151 : vector<8x1xf32>
    %153 = vector.broadcast %152 : vector<8x1xf32> to vector<8x32xf32>
    %154 = arith.subf %148, %153 : vector<8x32xf32>
    %155 = arith.mulf %154, %154 : vector<8x32xf32>
    %cst_50 = arith.constant dense<0.000000e+00> : vector<8xf32>
    %156 = vector.multi_reduction <add>, %155, %cst_50 [1] : vector<8x32xf32> to vector<8xf32>
    %157 = vector.shape_cast %156 : vector<8xf32> to vector<8x1xf32>
    %cst_51 = arith.constant 3.200000e+01 : f32
    %158 = vector.broadcast %cst_51 : f32 to vector<8x1xf32>
    %159 = arith.divf %157, %158 : vector<8x1xf32>
    %160 = vector.broadcast %152 : vector<8x1xf32> to vector<8x32xf32>
    %161 = arith.subf %148, %160 : vector<8x32xf32>
    %cst_52 = arith.constant 9.99999974E-6 : f32
    %162 = vector.broadcast %cst_52 : f32 to vector<8x1xf32>
    %163 = arith.addf %159, %162 : vector<8x1xf32>
    %164 = math.rsqrt %163 : vector<8x1xf32>
    %165 = vector.broadcast %164 : vector<8x1xf32> to vector<8x32xf32>
    %166 = arith.mulf %161, %165 : vector<8x32xf32>
    %167 = vector.broadcast %15 : vector<1x32xf32> to vector<8x32xf32>
    %168 = arith.mulf %166, %167 : vector<8x32xf32>
    %169 = vector.broadcast %16 : vector<1x32xf32> to vector<8x32xf32>
    %170 = arith.addf %168, %169 : vector<8x32xf32>
    %c0_53 = arith.constant 0 : index
    %c0_54 = arith.constant 0 : index
    %c0_55 = arith.constant 0 : index
    %171 = vector.load %arg8[%c0_53, %c0_54, %c0_55] : memref<1x8x32xf32, #tpu.memory_space<vmem>>, vector<1x8x32xf32>
    %172 = vector.shape_cast %171 : vector<1x8x32xf32> to vector<8x32xf32>
    %173 = vector.shape_cast %170 : vector<8x32xf32> to vector<1x8x32xf32>
    tpu.vector_store %arg8[%c0_53, %c0_54, %c0_55], %173 {strides = array<i32>} : memref<1x8x32xf32, #tpu.memory_space<vmem>>, vector<1x8x32xf32>,
    return
  }
  func.func @transform_0(%arg0: i32) -> (i32, i32, i32) {
    %c0_i32 = arith.constant 0 : i32
    %c0_i32_0 = arith.constant 0 : i32
    %c0_i32_1 = arith.constant 0 : i32
    return %arg0, %c0_i32, %c0_i32_0 : i32, i32, i32
  }
  func.func @transform_1(%arg0: i32) -> (i32, i32) {
    %c0_i32 = arith.constant 0 : i32
    %c0_i32_0 = arith.constant 0 : i32
    %c0_i32_1 = arith.constant 0 : i32
    return %c0_i32, %c0_i32_0 : i32, i32
  }
  func.func @transform_2(%arg0: i32) -> (i32, i32) {
    %c0_i32 = arith.constant 0 : i32
    %c0_i32_0 = arith.constant 0 : i32
    %c0_i32_1 = arith.constant 0 : i32
    return %c0_i32, %c0_i32_0 : i32, i32
  }
  func.func @transform_3(%arg0: i32) -> (i32, i32) {
    %c0_i32 = arith.constant 0 : i32
    %c0_i32_0 = arith.constant 0 : i32
    %c0_i32_1 = arith.constant 0 : i32
    return %c0_i32, %c0_i32_0 : i32, i32
  }
  func.func @transform_4(%arg0: i32) -> (i32, i32) {
    %c0_i32 = arith.constant 0 : i32
    %c0_i32_0 = arith.constant 0 : i32
    %c0_i32_1 = arith.constant 0 : i32
    return %c0_i32, %c0_i32_0 : i32, i32
  }
  func.func @transform_5(%arg0: i32) -> (i32, i32) {
    %c0_i32 = arith.constant 0 : i32
    %c0_i32_0 = arith.constant 0 : i32
    %c0_i32_1 = arith.constant 0 : i32
    return %c0_i32, %c0_i32_0 : i32, i32
  }
  func.func @transform_6(%arg0: i32) -> (i32, i32) {
    %c0_i32 = arith.constant 0 : i32
    %c0_i32_0 = arith.constant 0 : i32
    %c0_i32_1 = arith.constant 0 : i32
    return %c0_i32, %c0_i32_0 : i32, i32
  }
  func.func @transform_7(%arg0: i32) -> (i32, i32, i32) {
    %c0_i32 = arith.constant 0 : i32
    %c0_i32_0 = arith.constant 0 : i32
    %c0_i32_1 = arith.constant 0 : i32
    return %arg0, %c0_i32, %c0_i32_0 : i32, i32, i32
  }
}

</mosaic_0001>

<bundles_post_ra>
// kernel: tpu_custom_call.1
= control target key start
LH: loop header
LB: loop body
LE: loop exit
PB: predicated region body
PF: predicated region fallthrough
CT: control target
= control target key end

     0   :  { %12 = vsyncpa [#allocation3], 0  ;;  %s2107_s0 = inlined_call_operand.vmem [shape: f32[2,8,32], index: 0, kind: input, shape index: {}]   ;;  %s2108_s1 = inlined_call_operand.vmem [shape: f32[8,32], index: 1, kind: input, shape index: {}]   ;;  %s2109_s2 = inlined_call_operand.vmem [shape: f32[32,12], index: 2, kind: input, shape index: {}]   ;;  %s2110_s3 = inlined_call_operand.vmem [shape: f32[4,32], index: 3, kind: input, shape index: {}]   ;;  %s2111_s4 = inlined_call_operand.vmem [shape: f32[32,64], index: 4, kind: input, shape index: {}]   ;;  %s2112_s5 = inlined_call_operand.vmem [shape: f32[64,32], index: 5, kind: input, shape index: {}]   ;;  %s2113_s6 = inlined_call_operand.vmem [shape: f32[8,64], index: 6, kind: input, shape index: {}]   ;;  %s2114_s7 = inlined_call_operand.hbm [shape: f32[2,8,32], index: 7, kind: output, shape index: {}]  }
   0x1   :  { %14 = vsyncpa [#allocation3 + $0x1], 0  ;;  %s1744_s24 = smov 0   ;;  %s1746_s25 = smov 0  }
   0x2   :  { %s1748_s26 = smov 0   ;;  %s1750_s27 = smov 0  }
   0x3 LB: > { %s1765_s28 = sadd.s32 4294967295, %s1697_s27   ;;  %s1390_s29 = sadd.s32 4294967294, %s1697_s27   ;;  %s1697_s27 = sphi %s1750_s27, %s2120_s27   ;;  %s1693_s26 = sphi %s1748_s26, %s2119_s26   ;;  %s1689_s25 = sphi %s1746_s25, %s2118_s25   ;;  %s1685_s24 = sphi %s1744_s24, %s2117_s24  }
   0x4   : > { %s1769_s30 = sadd.s32 1, %s1697_s27   ;;  %s179_s8 = sadd.s32 1, %s1693_s26 }
   0x5   : > { %s176_s9 = ssub.s32 %s1697_s27, %s1769_s30  ;;  %p189_p0 = scmp.ne.s32.totalorder %s1693_s26, %s1689_s25 }
   0x6   : > { %p177_p1 = scmp.eq.s32.totalorder %s176_s9, 0  ;;  %p190_p2 = scmp.eq.s32.totalorder %s1765_s28, 1 }
   0x7   : > { %p195_p3 = scmp.ne.s32.totalorder %s1689_s25, %s1685_s24  ;;  %p196_p4 = scmp.eq.s32.totalorder %s1390_s29, 1 }
   0x8   : > { %s1780_s10 = scalar_select %p177_p1, %s1693_s26, %s179_s8  }
   0x9   : > { %p1782_p5 = por %p190_p2, %p189_p0  ;;  %p1786_p6 = por %p196_p4, %p195_p3 }
   0xa   : > { %p1393_p7 = scmp.ge.s32.totalorder %s1697_s27, 1  ;;  %p239_p8 = scmp.lt.s32.totalorder %s1697_s27, 3 }
   0xc   : > { %p240_p9 = pnand %p1393_p7, %p239_p8 }
   0xd   : > { %p270_p10 = scmp.lt.s32.totalorder (!%p240_p9), %s1765_s28, 1  ;;  %s1701_s16 = smov (!%p240_p9), 120  }
   0xe   : > { %243 = sbr.rel (%p240_p9) target bundleno = 4175 (0x104f), region = 48 }
  0x13   : > { %v1795_v0 = vld [vmem:[%s2109_s2 + $0x18] sm:$0xff]  ;;  %v1699_v1 = vmov 0.0   ;;  %v1802_v2 = vld [vmem:[%s2109_s2 + $0x10] sm:$0xff]  ;;  %vm1700_vm0 = vmmov 0   ;;  %s271_s17 = scalar_select %p270_p10, %s1765_s28, 1  ;;  %v1813_v3 = vld [vmem:[%s2109_s2 + $0x8] sm:$0xff]  ;;  %v295_v8 = vlaneseq }
  0x14   : > { %1466 = vmatprep.subr.mxu0 %v1699_v1  ;;  %1474 = vmatprep.mubr.msk.f32.mxu0 %vm1700_vm0, %v1699_v1  ;;  %v275_v4 = vld [vmem:[%s2108_s1] sm:$0xff]  ;;  %vm299_vm1 = vcmask 261120   ;;  %vm376_vm2 = vcmask 31744   ;;  %vm452_vm3 = vcmask 64512   ;;  %vm547_vm4 = vcmask 1043456   ;;  %v1883_v45 = vld [vmem:[%s2111_s4 + $0x18] sm:$0xff] }
  0x15   : > { %1467 = vmatpush3.msra.mxu0 %v1795_v0  ;;  %1482 = vmatprep.subr.mxu1 %v1699_v1  ;;  %s1395_s20 = sshll.u32 %s271_s17, 3  ;;  %v1825_v5 = vld [vmem:[%s2109_s2] sm:$0xff]  ;;  %v1837_v9 = vshrl.u32 %v295_v8, 7  ;;  %s1702_s17 = smov 124   ;;  %v1890_v46 = vld [vmem:[%s2111_s4 + $0x10] sm:$0xff]  ;;  %v1895_v47 = vld [vmem:[%s2111_s4 + $0x8] sm:$0xff] }
  0x16   : > { %1468 = vmatprep.subr.mxu0 %v1699_v1  ;;  %1484 = vmatprep.mubr.msk.f32.mxu1 %vm1700_vm0, %v1699_v1  ;;  %s273_s13 = scalar_lea.vmem %s2107_s0, %s1395_s20  ;;  %v1843_v11 = vld [vmem:[%s2113_s6] sm:$0xff]  ;;  %v1910_v49 = vld [vmem:[%s2112_s5 + $0x38] sm:$0xff]  ;;  %v1915_v50 = vld [vmem:[%s2112_s5 + $0x30] sm:$0xff]  ;;  %vm728_vm5 = vcmask 523264   ;;  %s1413_s20 = sshll.u32 %s1765_s28, 7 }
  0x17   : > { %1469 = vmatpush3.msra.mxu0 %v1802_v2  ;;  %v274_v6 = vld [vmem:[%s273_s13] sm:$0xff]  ;;  %v297_v10 = vsub.s32 0, %v1837_v9  ;;  %v542_v33 = vsub.s32 1, %v1837_v9  ;;  %v1923_v51 = vld [vmem:[%s2112_s5 + $0x28] sm:$0xff]  ;;  %v1937_v53 = vld [vmem:[%s2112_s5 + $0x18] sm:$0xff]  ;;  %v638_v57 = vsub.s32 2, %v1837_v9  ;;  %s1329_s8 = scalar_lea.hbm %s2114_s7, %s1413_s20 }
  0x18   : > { %1470 = vmatprep.subr.mxu0 %v1699_v1  ;;  %v276_v7 = vadd.f32 %v275_v4, %v274_v6  ;;  %v1865_v27 = vld [vmem:[%s2110_s3] sm:$0xf]  ;;  %v643_v58 = vsub.s32 3, %v1837_v9  ;;  %s1703_s28 = smov [#allocation2]  }
  0x19   : > { %1471 = vmatpush3.msra.mxu0 %v1813_v3  ;;  %v1846_v12 = vrot.slane %v1843_v11, %v297_v10  ;;  %v1875_v34 = vrot.slane %v1843_v11, %v542_v33  ;;  %v1902_v48 = vld [vmem:[%s2111_s4] sm:$0xff]  ;;  %v1946_v59 = vrot.slane %v1843_v11, %v638_v57  ;;  %s1641_s14 = sshll.u32 %s1703_s28, 4  ;;  %s1642_s14 = int_to_ptr.vmem [resolvable:$false] %s1641_s14 }
  0x1a   : > { %1472 = vmatprep.subr.mxu0 %v1699_v1  ;;  %v1930_v52 = vld [vmem:[%s2112_s5 + $0x20] sm:$0xff]  ;;  %v1949_v62 = vrot.slane %v1843_v11, %v643_v58  ;;  %s1643_s15 = scalar_lea.vmem %s1642_s14, 256 }
  0x1b   : > { %1473 = vmatpush3.msra.mxu0 %v1825_v5 }
  0x1c   : > { %1475 = vmatmul.mubr.msk.f32.vlgmr.msra.gmra.mxu0 %vm299_vm1, %v276_v7  ;;  %1477 = vmatprep.subr.mxu0 %v1699_v1 }
  0x1d   : > { %1479 = vmatprep.mubr.msk.f32.mxu0 %vm1700_vm0, %v1699_v1 }
  0xdc   : > { %v369_v13 = vpop.f32.mrf.mxu0 }
  0xdd   : > { %v370_v14 = vadd.f32 %v369_v13, %v1846_v12 }
  0xde   : > { %v1476_v15 = vpop.f32.mrf.mxu0 }
  0xdf   : > { %463 = vrot.lane.b32.xlu1 %v370_v14, %s1701_s16  ;;  %374 = vrot.lane.b32.xlu0 %v370_v14, %s1702_s17 }
 0x151   : > { %v464_v16 = vpop.permute.xlu1 %463  ;;  %v375_v17 = vpop.permute.xlu0 %374 }
 0x152   : > { %1478 = vmatpush3.xpose.msk.msra.mxu0 %vm376_vm2, %v375_v17  ;;  %1483 = vmatpush3.msra.mxu1 %v464_v16 }
 0x153   : > { %1487 = vmatprep.subr.mxu0 %v1699_v1  ;;  %1492 = vmatprep.subr.mxu1 %v1699_v1 }
 0x155   : > { %1480 = vmatmul.mubr.msk.f32.vlgmr.msra.gmra.mxu0 %vm376_vm2, %v370_v14  ;;  %v726_v14 = vsub.s32 5, %v1837_v9 }
 0x156   : > { %1489 = vmatprep.mubr.msk.f32.mxu0 %vm1700_vm0, %v1699_v1  ;;  %1488 = vmatpush3.msk.msra.mxu0 %vm547_vm4, %v1865_v27 }
 0x157   : > { %1503 = vmatprep.subr.mxu0 %v1699_v1  ;;  %v1995_v15 = vrot.slane %v1843_v11, %v726_v14 }
 0x215   : > { %v447_v18 = vpop.f32.mrf.mxu0 }
 0x216   : > { %v451_v19 = vmul.f32 0.5, %v447_v18 }
 0x217   : > { %v1481_v20 = vpop.f32.mrf.mxu0 }
 0x218   : > { %v453_v21 = vsel %vm452_vm3, %v451_v19, -inf }
 0x219   : > { %454 = vmax.xlane.f32.xlu0 %v453_v21 }
 0x2a2   : > { %v455_v22 = vpop.xlane.xlu0 %454 }
 0x2a3   : > { %v456_v23 = vsub.f32 %v451_v19, %v455_v22 }
 0x2a5   : > { %v457_v24 = vmul.f32 1.442695, %v456_v23 }
 0x2a7   : > { %1621 = vpow2.f32 %v457_v24 }
 0x2b4   : > { %v1622_v25 = vpop.eup %1621 }
 0x2b5   : > { %1485 = vmatmul.mubr.msk.f32.vlgmr.msra.gmra.mxu1 %vm452_vm3, %v1622_v25  ;;  %v459_v26 = vsel %vm452_vm3, %v1622_v25, 0.0 }
 0x2b6   : > { %460 = vadd.xlane.f32.xlu1 %v459_v26  ;;  %1500 = vmatprep.mubr.msk.f32.mxu1 %vm1700_vm0, %v1699_v1 }
 0x2b7   : > { %1493 = vmatpush3.msra.mxu1 %v1883_v45 }
 0x2b8   : > { %1494 = vmatprep.subr.mxu1 %v1699_v1 }
 0x2b9   : > { %1495 = vmatpush3.msra.mxu1 %v1890_v46 }
 0x2ba   : > { %1496 = vmatprep.subr.mxu1 %v1699_v1 }
 0x2bb   : > { %1497 = vmatpush3.msra.mxu1 %v1895_v47 }
 0x2bc   : > { %1498 = vmatprep.subr.mxu1 %v1699_v1 }
 0x2bd   : > { %1499 = vmatpush3.msra.mxu1 %v1902_v48 }
 0x2be   : > { %1522 = vmatprep.subr.mxu1 %v1699_v1 }
 0x33f   : > { %v461_v28 = vpop.xlane.xlu1 %460 }
 0x340   : > { %1623 = vrcp.f32 %v461_v28 }
 0x34d   : > { %v1624_v29 = vpop.eup %1623 }
 0x375   : > { %v535_v30 = vpop.f32.mrf.mxu1 }
 0x376   : > { %v539_v31 = vmul.f32 %v1624_v29, %v535_v30  ;;  %v818_v30 = vsub.s32 6, %v1837_v9 }
 0x377   : > { %v1486_v32 = vpop.f32.mrf.mxu1 }
 0x378   : > { %1490 = vmatmul.mubr.msk.f32.vlgmr.msra.gmra.mxu0 %vm376_vm2, %v539_v31  ;;  %v823_v31 = vsub.s32 7, %v1837_v9  ;;  %v2003_v32 = vrot.slane %v1843_v11, %v818_v30 }
 0x379   : > { %1519 = vmatprep.mubr.msk.f32.mxu0 %vm1700_vm0, %v1699_v1  ;;  %1504 = vmatpush3.msra.mxu0 %v1910_v49 }
 0x37a   : > { %1505 = vmatprep.subr.mxu0 %v1699_v1 }
 0x37b   : > { %1506 = vmatpush3.msra.mxu0 %v1915_v50 }
 0x37c   : > { %1507 = vmatprep.subr.mxu0 %v1699_v1 }
 0x37d   : > { %1508 = vmatpush3.msra.mxu0 %v1923_v51 }
 0x37e   : > { %1509 = vmatprep.subr.mxu0 %v1699_v1 }
 0x37f   : > { %1510 = vmatpush3.msra.mxu0 %v1930_v52 }
 0x380   : > { %1511 = vmatprep.subr.mxu0 %v1699_v1 }
 0x381   : > { %1512 = vmatpush3.msra.mxu0 %v1937_v53 }
 0x382   : > { %1513 = vmatprep.subr.mxu0 %v1699_v1 }
 0x438   : > { %v617_v35 = vpop.f32.mrf.mxu0 }
 0x439   : > { %v618_v36 = vadd.f32 %v617_v35, %v1875_v34 }
 0x43a   : > { %v1491_v37 = vpop.f32.mrf.mxu0 }
 0x43b   : > { %v621_v38 = vadd.f32 %v618_v36, %v276_v7  ;;  %v2006_v36 = vrot.slane %v1843_v11, %v823_v31 }
 0x43d   : > { %v622_v39 = vsel %vm299_vm1, %v621_v38, 0.0 }
 0x43e   : > { %623 = vadd.xlane.f32.xlu0 %v622_v39 }
 0x4c7   : > { %v624_v40 = vpop.xlane.xlu0 %623 }
 0x4c8   : > { %v626_v41 = vmul.f32 0.03125, %v624_v40 }
 0x4ca   : > { %v627_v42 = vsub.f32 %v621_v38, %v626_v41 }
 0x4cc   : > { %v628_v43 = vmul.f32 %v627_v42, %v627_v42 }
 0x4ce   : > { %v629_v44 = vsel %vm299_vm1, %v628_v43, 0.0 }
 0x4cf   : > { %630 = vadd.xlane.f32.xlu0 %v629_v44 }
 0x558   : > { %v631_v54 = vpop.xlane.xlu0 %630 }
 0x559   : > { %v632_v55 = vmul.f32 0.03125, %v631_v54 }
 0x55b   : > { %v633_v56 = vadd.f32 1e-05, %v632_v55 }
 0x55d   : > { %1625 = vrsqrt.f32 %v633_v56 }
 0x56a   : > { %v1626_v60 = vpop.eup %1625 }
 0x56b   : > { %v635_v61 = vmul.f32 %v1626_v60, %v627_v42 }
 0x56d   : > { %v640_v63 = vmul.f32 %v1946_v59, %v635_v61 }
 0x56f   : > { %v645_v4 = vadd.f32 %v1949_v62, %v640_v63 }
 0x571   : > { %1501 = vmatmul.mubr.msk.f32.vlgmr.msra.gmra.mxu1 %vm299_vm1, %v645_v4 }
 0x572   : > { %1523 = vmatpush3.msra.mxu1 %v1795_v0  ;;  %1530 = vmatprep.mubr.msk.f32.mxu1 %vm1700_vm0, %v1699_v1  ;;  %v1967_v0 = vld [vmem:[%s2112_s5 + $0x10] sm:$0xff] }
 0x573   : > { %1524 = vmatprep.subr.mxu1 %v1699_v1  ;;  %1514 = vmatpush3.msra.mxu0 %v1967_v0 }
 0x574   : > { %1525 = vmatpush3.msra.mxu1 %v1802_v2  ;;  %1515 = vmatprep.subr.mxu0 %v1699_v1  ;;  %v1974_v2 = vld [vmem:[%s2112_s5 + $0x8] sm:$0xff] }
 0x575   : > { %1526 = vmatprep.subr.mxu1 %v1699_v1  ;;  %1516 = vmatpush3.msra.mxu0 %v1974_v2 }
 0x576   : > { %1527 = vmatpush3.msra.mxu1 %v1813_v3  ;;  %1517 = vmatprep.subr.mxu0 %v1699_v1  ;;  %v1981_v3 = vld [vmem:[%s2112_s5] sm:$0xff] }
 0x577   : > { %1528 = vmatprep.subr.mxu1 %v1699_v1  ;;  %1518 = vmatpush3.msra.mxu0 %v1981_v3 }
 0x578   : > { %1529 = vmatpush3.msra.mxu1 %v1825_v5  ;;  %1538 = vmatprep.subr.mxu0 %v1699_v1  ;;  %v648_v5 = vsub.s32 4, %v1837_v9 }
 0x579   : > { %1533 = vmatprep.subr.mxu1 %v1699_v1 }
 0x57a   : > { %v1987_v6 = vrot.slane %v1843_v11, %v648_v5 }
 0x631   : > { %v719_v7 = vpop.f32.mrf.mxu1 }
 0x632   : > { %v720_v8 = vadd.f32 %v719_v7, %v1987_v6 }
 0x633   : > { %v1502_v10 = vpop.f32.mrf.mxu1 }
 0x634   : > { %v723_v13 = vmax.f32 %v720_v8, 0.0 }
 0x636   : > { %1520 = vmatmul.mubr.msk.f32.vlgmr.msra.gmra.mxu0 %vm728_vm5, %v723_v13 }
 0x637   : > { %1540 = vmatprep.mubr.msk.f32.mxu0 %vm1700_vm0, %v1699_v1 }
 0x6f6   : > { %v798_v16 = vpop.f32.mrf.mxu0 }
 0x6f7   : > { %v799_v17 = vadd.f32 %v798_v16, %v1995_v15 }
 0x6f8   : > { %v1521_v18 = vpop.f32.mrf.mxu0 }
 0x6f9   : > { %v802_v19 = vadd.f32 %v799_v17, %v645_v4 }
 0x6fb   : > { %v803_v20 = vsel %vm299_vm1, %v802_v19, 0.0 }
 0x6fc   : > { %804 = vadd.xlane.f32.xlu1 %v803_v20 }
 0x785   : > { %v805_v21 = vpop.xlane.xlu1 %804 }
 0x786   : > { %v806_v22 = vmul.f32 0.03125, %v805_v21 }
 0x788   : > { %v807_v23 = vsub.f32 %v802_v19, %v806_v22 }
 0x78a   : > { %v808_v24 = vmul.f32 %v807_v23, %v807_v23 }
 0x78c   : > { %v809_v25 = vsel %vm299_vm1, %v808_v24, 0.0 }
 0x78d   : > { %810 = vadd.xlane.f32.xlu0 %v809_v25 }
 0x816   : > { %v811_v26 = vpop.xlane.xlu0 %810 }
 0x817   : > { %v812_v28 = vmul.f32 0.03125, %v811_v26 }
 0x819   : > { %v813_v29 = vadd.f32 1e-05, %v812_v28 }
 0x81b   : > { %1627 = vrsqrt.f32 %v813_v29 }
 0x828   : > { %v1628_v33 = vpop.eup %1627 }
 0x829   : > { %v815_v35 = vmul.f32 %v1628_v33, %v807_v23 }
 0x82b   : > { %v820_v37 = vmul.f32 %v2003_v32, %v815_v35 }
 0x82d   : > { %v2010_v38 = vadd.f32 %v2006_v36, %v820_v37 }
 0x82f   : > { %1531 = vmatmul.mubr.msk.f32.vlgmr.msra.gmra.mxu1 %vm299_vm1, %v2010_v38 }
 0x830   : > { %1535 = vmatprep.mubr.msk.f32.mxu1 %vm1700_vm0, %v1699_v1 }
 0x8ef   : > { %v895_v9 = vpop.f32.mrf.mxu1 }
 0x8f0   : > { %v896_v39 = vadd.f32 %v895_v9, %v1846_v12 }
 0x8f1   : > { %v1532_v40 = vpop.f32.mrf.mxu1 }
 0x8f2   : > { %900 = vrot.lane.b32.xlu1 %v896_v39, %s1702_s17 }
 0x964   : > { %v901_v41 = vpop.permute.xlu1 %900 }
 0x965   : > { %1534 = vmatpush3.xpose.msk.msra.mxu1 %vm376_vm2, %v901_v41 }
 0x966   : > { %1543 = vmatprep.subr.mxu1 %v1699_v1 }
 0x968   : > { %1536 = vmatmul.mubr.msk.f32.vlgmr.msra.gmra.mxu1 %vm376_vm2, %v896_v39 }
 0x969   : > { %1544 = vmatpush3.msk.msra.mxu1 %vm547_vm4, %v1865_v27  ;;  %1545 = vmatprep.mubr.msk.f32.mxu1 %vm1700_vm0, %v1699_v1 }
 0x96a   : > { %1559 = vmatprep.subr.mxu1 %v1699_v1 }
 0xa28   : > { %v972_v11 = vpop.f32.mrf.mxu1 }
 0xa29   : > { %v976_v12 = vmul.f32 0.5, %v972_v11 }
 0xa2a   : > { %v1537_v42 = vpop.f32.mrf.mxu1 }
 0xa2b   : > { %v977_v43 = vsel %vm452_vm3, %v976_v12, -inf }
 0xa2c   : > { %978 = vmax.xlane.f32.xlu0 %v977_v43 }
 0xa42   : > { %987 = vrot.lane.b32.xlu0 %v896_v39, %s1701_s16  ;;  %s267_s16 = sand.u32 1, %s1689_s25  }
 0xa43   : > { %s1394_s17 = sshll.u32 %s267_s16, 3  ;;  %s1318_s9 = scalar_lea.sflag [#allocation3], %s267_s16 }
 0xa44   : > { %s269_s21 = scalar_lea.vmem [#allocation2], %s1394_s17 }
 0xa45   : > { %s1331_s22 = sshll.u32 %s269_s21, 4  ;;  %s1332_s22 = int_to_ptr.vmem [resolvable:$true] %s1331_s22 }
 0xa46   : > { %s1637_s13 = scalar_lea.vmem %s1332_s22, 128  ;;  %p1644_p0 = scmp.lt.s32.totalorder %s1332_s22, %s1642_s14 }
 0xa47   : > { %p1638_p11 = scmp.ne.s32.totalorder %s1332_s22, %s1637_s13  ;;  %p1645_p1 = scmp.lt.s32.totalorder %s1643_s15, %s1637_s13 }
 0xa49   : > { %p1639_p12 = pnand %p1638_p11, %p1782_p5  ;;  %p1646_p2 = por %p1645_p1, %p1644_p0 }
 0xa4b   : > { %p1640_p13 = pneg %p1639_p12 }
 0xa4d   : > { %p1647_p3 = pnand %p1646_p2, %p1640_p13 }
 0xab5   : > { %v979_v44 = vpop.xlane.xlu0 %978 }
 0xab6   : > { %v980_v54 = vsub.f32 %v976_v12, %v979_v44 }
 0xab8   : > { %v981_v55 = vmul.f32 1.442695, %v980_v54 }
 0xab9   : > { %v988_v56 = vpop.permute.xlu0 %987 }
 0xaba   : > { %1629 = vpow2.f32 %v981_v55  ;;  %1539 = vmatpush3.msra.mxu0 %v988_v56 }
 0xabb   : > { %1548 = vmatprep.subr.mxu0 %v1699_v1 }
 0xac7   : > { %v1630_v27 = vpop.eup %1629 }
 0xac8   : > { %1541 = vmatmul.mubr.msk.f32.vlgmr.msra.gmra.mxu0 %vm452_vm3, %v1630_v27  ;;  %v983_v57 = vsel %vm452_vm3, %v1630_v27, 0.0 }
 0xac9   : > { %984 = vadd.xlane.f32.xlu1 %v983_v57  ;;  %1549 = vmatpush3.msra.mxu0 %v1883_v45 }
 0xaca   : > { %1550 = vmatprep.subr.mxu0 %v1699_v1  ;;  %1556 = vmatprep.mubr.msk.f32.mxu0 %vm1700_vm0, %v1699_v1 }
 0xacb   : > { %1551 = vmatpush3.msra.mxu0 %v1890_v46 }
 0xacc   : > { %1552 = vmatprep.subr.mxu0 %v1699_v1 }
 0xacd   : > { %1553 = vmatpush3.msra.mxu0 %v1895_v47 }
 0xace   : > { %1554 = vmatprep.subr.mxu0 %v1699_v1 }
 0xacf   : > { %1555 = vmatpush3.msra.mxu0 %v1902_v48 }
 0xb52   : > { %v985_v58 = vpop.xlane.xlu1 %984 }
 0xb53   : > { %1631 = vrcp.f32 %v985_v58 }
 0xb60   : > { %v1632_v60 = vpop.eup %1631 }
 0xb88   : > { %v1059_v61 = vpop.f32.mrf.mxu0 }
 0xb89   : > { %v1063_v45 = vmul.f32 %v1632_v60, %v1059_v61 }
 0xb8a   : > { %v1542_v63 = vpop.f32.mrf.mxu0 }
 0xb8b   : > { %1546 = vmatmul.mubr.msk.f32.vlgmr.msra.gmra.mxu1 %vm376_vm2, %v1063_v45 }
 0xb8c   : > { %1560 = vmatpush3.msra.mxu1 %v1910_v49  ;;  %1575 = vmatprep.mubr.msk.f32.mxu1 %vm1700_vm0, %v1699_v1 }
 0xb8d   : > { %1561 = vmatprep.subr.mxu1 %v1699_v1 }
 0xb8e   : > { %1562 = vmatpush3.msra.mxu1 %v1915_v50 }
 0xb8f   : > { %1563 = vmatprep.subr.mxu1 %v1699_v1 }
 0xb90   : > { %1564 = vmatpush3.msra.mxu1 %v1923_v51 }
 0xb91   : > { %1565 = vmatprep.subr.mxu1 %v1699_v1 }
 0xb92   : > { %1566 = vmatpush3.msra.mxu1 %v1930_v52 }
 0xb93   : > { %1567 = vmatprep.subr.mxu1 %v1699_v1 }
 0xb94   : > { %1568 = vmatpush3.msra.mxu1 %v1937_v53 }
 0xb95   : > { %1569 = vmatprep.subr.mxu1 %v1699_v1 }
 0xb96   : > { %1570 = vmatpush3.msra.mxu1 %v1967_v0 }
 0xb97   : > { %1571 = vmatprep.subr.mxu1 %v1699_v1 }
 0xb98   : > { %1572 = vmatpush3.msra.mxu1 %v1974_v2 }
 0xb99   : > { %1573 = vmatprep.subr.mxu1 %v1699_v1 }
 0xb9a   : > { %1574 = vmatpush3.msra.mxu1 %v1981_v3 }
 0xc4b   : > { %v1133_v46 = vpop.f32.mrf.mxu1 }
 0xc4c   : > { %v1134_v47 = vadd.f32 %v1133_v46, %v1875_v34 }
 0xc4d   : > { %v1547_v48 = vpop.f32.mrf.mxu1 }
 0xc4e   : > { %v1137_v49 = vadd.f32 %v1134_v47, %v2010_v38 }
 0xc50   : > { %v1138_v50 = vsel %vm299_vm1, %v1137_v49, 0.0 }
 0xc51   : > { %1139 = vadd.xlane.f32.xlu0 %v1138_v50 }
 0xcda   : > { %v1140_v51 = vpop.xlane.xlu0 %1139 }
 0xcdb   : > { %v1141_v52 = vmul.f32 0.03125, %v1140_v51 }
 0xcdd   : > { %v1142_v53 = vsub.f32 %v1137_v49, %v1141_v52 }
 0xcdf   : > { %v1143_v4 = vmul.f32 %v1142_v53, %v1142_v53 }
 0xce1   : > { %v1144_v0 = vsel %vm299_vm1, %v1143_v4, 0.0 }
 0xce2   : > { %1145 = vadd.xlane.f32.xlu1 %v1144_v0 }
 0xd6b   : > { %v1146_v2 = vpop.xlane.xlu1 %1145 }
 0xd6c   : > { %v1147_v1 = vmul.f32 0.03125, %v1146_v2 }
 0xd6e   : > { %v1148_v5 = vadd.f32 1e-05, %v1147_v1 }
 0xd70   : > { %1633 = vrsqrt.f32 %v1148_v5 }
 0xd7d   : > { %v1634_v3 = vpop.eup %1633 }
 0xd7e   : > { %v1150_v7 = vmul.f32 %v1634_v3, %v1142_v53 }
 0xd80   : > { %v1151_v34 = vmul.f32 %v1150_v7, %v1946_v59 }
 0xd82   : > { %v1152_v8 = vadd.f32 %v1151_v34, %v1949_v62 }
 0xd84   : > { %1557 = vmatmul.mubr.msk.f32.vlgmr.msra.gmra.mxu0 %vm299_vm1, %v1152_v8 }
 0xe44   : > { %v1222_v10 = vpop.f32.mrf.mxu0 }
 0xe45   : > { %v1223_v13 = vadd.f32 %v1222_v10, %v1987_v6 }
 0xe46   : > { %v1558_v14 = vpop.f32.mrf.mxu0 }
 0xe47   : > { %v1226_v16 = vmax.f32 %v1223_v13, 0.0 }
 0xe49   : > { %1576 = vmatmul.mubr.msk.f32.vlgmr.msra.gmra.mxu1 %vm728_vm5, %v1226_v16 }
 0xf09   : > { %v1296_v17 = vpop.f32.mrf.mxu1 }
 0xf0a   : > { %v1297_v18 = vadd.f32 %v1296_v17, %v1995_v15 }
 0xf0b   : > { %v1577_v19 = vpop.f32.mrf.mxu1 }
 0xf0c   : > { %v1300_v20 = vadd.f32 %v1297_v18, %v1152_v8 }
 0xf0e   : > { %v1301_v21 = vsel %vm299_vm1, %v1300_v20, 0.0 }
 0xf0f   : > { %1302 = vadd.xlane.f32.xlu1 %v1301_v21 }
 0xf98   : > { %v1303_v59 = vpop.xlane.xlu1 %1302 }
 0xf99   : > { %v1304_v62 = vmul.f32 0.03125, %v1303_v59 }
 0xf9b   : > { %v1305_v22 = vsub.f32 %v1300_v20, %v1304_v62 }
 0xf9d   : > { %v1306_v23 = vmul.f32 %v1305_v22, %v1305_v22 }
 0xf9f   : > { %v1307_v6 = vsel %vm299_vm1, %v1306_v23, 0.0 }
 0xfa0   : > { %1308 = vadd.xlane.f32.xlu0 %v1307_v6 }
0x1029   : > { %v1309_v24 = vpop.xlane.xlu0 %1308 }
0x102a   : > { %v1310_v25 = vmul.f32 0.03125, %v1309_v24 }
0x102c   : > { %v1311_v26 = vadd.f32 1e-05, %v1310_v25 }
0x102e   : > { %1635 = vrsqrt.f32 %v1311_v26 }
0x103b   : > { %v1636_v15 = vpop.eup %1635 }
0x103c   : > { %v1313_v28 = vmul.f32 %v1636_v15, %v1305_v22 }
0x103e   : > { %v1314_v29 = vmul.f32 %v1313_v28, %v2003_v32 }
0x1040   : > { %v1315_v30 = vadd.f32 %v1314_v29, %v2006_v36 }
0x1042   : > { %1316 = vst.msk [vmem:[%s269_s21] sm:$0xff] %vm299_vm1, %v1315_v30 }
0x1043   : > { %1650 = shalt.err (!%p1647_p3)
}
0x1044   : > { %s1651_s18 = scalar_lea.hbm %s1329_s8, 128  ;;  %s1655_s17 = scalar_lea.hbm %s2114_s7, 256 }
0x1045   : > { %p1652_p4 = scmp.ne.s32.totalorder %s1329_s8, %s1651_s18  ;;  %p1656_p9 = scmp.lt.s32.totalorder %s1329_s8, %s2114_s7 }
0x1046   : > { %p1657_p10 = scmp.lt.s32.totalorder %s1655_s17, %s1651_s18 }
0x1047   : > { %p1653_p7 = pnand %p1652_p4, %p1782_p5 }
0x1048   : > { %p1658_p11 = por %p1657_p10, %p1656_p9 }
0x1049   : > { %p1654_p8 = pneg %p1653_p7 }
0x104b   : > { %p1659_p12 = pnand %p1658_p11, %p1654_p8 }
0x104d   : > { %1662 = shalt.err (!%p1659_p12)
}
0x104e   : > { %1578 = dma.vmem_to_hbm [thread:$0]  (%p1782_p5), %s1332_s22, 128, %s1329_s8, %s1318_s9  }
0x104f PF: > { %p1584_p13 = scmp.ge.s32.totalorder %s1697_s27, 2  ;;  %s1343_s23 = sand.u32 1, %s1685_s24  }
0x1050   : > { %s1344_s29 = scalar_lea.sflag [#allocation3], %s1343_s23 }
0x1051   : > { %p1581_p0 = pnand %p1584_p13, %p1786_p6 }
0x1053   : > { %p1582_p1 = pneg %p1581_p0 }
0x1055   : > { %1680 = dma.done.wait (%p1582_p1), %s1344_s29, 128  }
0x1056   : > { %1682 = vsyncadd (%p1582_p1), %s1344_s29, 4294967168  ;;  %p17_p2 = scmp.ge.s32.totalorder %s1769_s30, 4   ;;  %s2117_s24 = smov %s1689_s25 }
0x1057   : > { %s2118_s25 = smov %s1693_s26  ;;  %s2119_s26 = smov %s1780_s10 }
0x1058   : > { %s2120_s27 = smov %s1769_s30  ;;  %19 = sbr.rel (!%p17_p2) target bundleno = 3 (0x3), region = 83 }
0x105d   :  { %1349 = vsyncpa [#allocation3], 1 }
0x105e   :  { %1351 = vsyncpa [#allocation3 + $0x1], 1 }

</bundles_post_ra>
